<compile_context>
chip_gen: v7x
topology: tpu7x:2x2x1
jax: 0.10.0
libtpu: 0.0.40
codegen_flags: <defaults>
</compile_context>

<pallas_src>
import jax
import jax.numpy as jnp
from jax.experimental import pallas as pl
from jax.experimental.pallas import tpu as pltpu


def _round_up(x, m):
    return (x + m - 1) // m * m


# ----------------------------------------------------------------------------
# Kernel 1: fused  (im2col-patches @ (W * bn_scale))  +  bn_bias  -> ReLU
#   p_ref : (1, TP, K)    bf16   tile of im2col patch rows (K = KH*KW*Cin)
#   w_ref : (K, Cout)     bf16   BN-scale-folded weights
#   b_ref : (1, Cout)     f32    folded BN bias = beta - mean * scale
#   o_ref : (1, TP, Cout) f32
# ----------------------------------------------------------------------------
def conv_bn_relu_kernel(p_ref, w_ref, b_ref, o_ref):
    acc = jnp.dot(p_ref[0], w_ref[...], preferred_element_type=jnp.float32)
    o_ref[0] = jnp.maximum(acc + b_ref[...], 0.0)


# ----------------------------------------------------------------------------
# Kernel 2: MaxPool2d(kernel=3, stride=2, pad=1), vectorized.
#   x_ref    : (1, Ho, Wo, C)    f32 conv/BN/ReLU output
#   o_ref    : (1, Hpo, Wpo, C)  f32 pooled output
#   pad_ref  : (Ho+2, Wo+2, C)   f32 VMEM scratch, -inf border (in-kernel pad)
#   rmax_ref : (Hpo, Wo+2, C)    f32 VMEM scratch, row-reduced intermediate
# The 3x3/stride-2 window max = max of 3 row-strided slabs, then max of 3
# column-strided slabs — a handful of full-vreg VPU max ops per image.
# ----------------------------------------------------------------------------
def maxpool_kernel(x_ref, o_ref, pad_ref, rmax_ref):
    ho, wo = x_ref.shape[1], x_ref.shape[2]
    hpo, wpo = o_ref.shape[1], o_ref.shape[2]

    pad_ref[...] = jnp.full(pad_ref.shape, -jnp.inf, dtype=pad_ref.dtype)
    pad_ref[1:ho + 1, 1:wo + 1, :] = x_ref[0]

    rmax_ref[...] = jnp.maximum(
        jnp.maximum(pad_ref[pl.ds(0, hpo, 2), :, :],
                    pad_ref[pl.ds(1, hpo, 2), :, :]),
        pad_ref[pl.ds(2, hpo, 2), :, :])

    o_ref[0] = jnp.maximum(
        jnp.maximum(rmax_ref[:, pl.ds(0, wpo, 2), :],
                    rmax_ref[:, pl.ds(1, wpo, 2), :]),
        rmax_ref[:, pl.ds(2, wpo, 2), :])


# ----------------------------------------------------------------------------
# Wrapper: InputBlock.forward
#   conv(3->C, k=7, s=2, p=3, no bias) -> BN(eps=1e-3) -> ReLU -> MaxPool(3,2,1)
# BatchNorm is implemented in inference mode (running statistics).
# TODO(synk): training-mode BatchNorm (batch statistics reduction) not implemented.
# ----------------------------------------------------------------------------
def input_block_forward(x_nchw, w_oihw, gamma, beta, run_mean, run_var, eps=1e-3):
    N, Cin, H, W = x_nchw.shape
    Cout, _, KH, KW = w_oihw.shape
    S, P = 2, 3
    Ho = (H + 2 * P - KH) // S + 1
    Wo = (W + 2 * P - KW) // S + 1
    K = KH * KW * Cin
    PT = Ho * Wo

    # ---- glue: NCHW -> NHWC (single transpose+cast to bf16), pad, im2col ----
    x = jnp.transpose(x_nchw, (0, 2, 3, 1)).astype(jnp.bfloat16)
    xp = jnp.pad(x, ((0, 0), (P, P), (P, P), (0, 0)))
    cols = []
    for kh in range(KH):
        for kw in range(KW):
            cols.append(xp[:, kh:kh + S * (Ho - 1) + 1:S,
                              kw:kw + S * (Wo - 1) + 1:S, :])   # (N, Ho, Wo, Cin)
    patches = jnp.stack(cols, axis=3).reshape(N, PT, K)          # bf16

    # ---- fold BN scale into the weights; bias stays f32 ---------------------
    scale = gamma.astype(jnp.float32) / jnp.sqrt(run_var.astype(jnp.float32) + eps)
    bias = (beta.astype(jnp.float32)
            - run_mean.astype(jnp.float32) * scale).reshape(1, Cout)
    w_mat = jnp.transpose(w_oihw, (2, 3, 1, 0)).reshape(K, Cout).astype(jnp.float32)
    w_mat = (w_mat * scale[None, :]).astype(jnp.bfloat16)

    # ---- tile the patch-row (spatial) dimension ------------------------------
    # TP multiple of 8, capped so (patch tile + output tile) x double-buffering
    # stays comfortably within the v7x 64 MiB VMEM budget.
    TP = min(512, _round_up(PT, 8))
    PT_pad = _round_up(PT, TP)
    if PT_pad != PT:
        patches = jnp.pad(patches, ((0, 0), (0, PT_pad - PT), (0, 0)))
    n_pt = PT_pad // TP

    conv_out = pl.pallas_call(
        conv_bn_relu_kernel,
        out_shape=jax.ShapeDtypeStruct((N, PT_pad, Cout), jnp.float32),
        grid=(N, n_pt),
        in_specs=[
            pl.BlockSpec((1, TP, K), lambda n, p: (n, p, 0)),
            pl.BlockSpec((K, Cout), lambda n, p: (0, 0)),
            pl.BlockSpec((1, Cout), lambda n, p: (0, 0)),
        ],
        out_specs=pl.BlockSpec((1, TP, Cout), lambda n, p: (n, p, 0)),
        compiler_params=pltpu.CompilerParams(
            dimension_semantics=("parallel", "parallel")),
    )(patches, w_mat, bias)

    y = conv_out[:, :PT, :].reshape(N, Ho, Wo, Cout)

    # ---- max pool 3x3 stride 2 pad 1 (boundaries handled inside the kernel) --
    Hpo = (Ho + 2 - 3) // 2 + 1
    Wpo = (Wo + 2 - 3) // 2 + 1

    pooled = pl.pallas_call(
        maxpool_kernel,
        out_shape=jax.ShapeDtypeStruct((N, Hpo, Wpo, Cout), jnp.float32),
        grid=(N,),
        in_specs=[pl.BlockSpec((1, Ho, Wo, Cout), lambda n: (n, 0, 0, 0))],
        out_specs=pl.BlockSpec((1, Hpo, Wpo, Cout), lambda n: (n, 0, 0, 0)),
        scratch_shapes=[
            pltpu.VMEM((Ho + 2, Wo + 2, Cout), jnp.float32),
            pltpu.VMEM((Hpo, Wo + 2, Cout), jnp.float32),
        ],
        compiler_params=pltpu.CompilerParams(dimension_semantics=("parallel",)),
    )(y)

    return jnp.transpose(pooled, (0, 3, 1, 2))  # back to NCHW


# ----------------------------------------------------------------------------
# Pure-JAX reference (for correctness check)
# ----------------------------------------------------------------------------
def reference_forward(x, w, gamma, beta, run_mean, run_var, eps=1e-3):
    conv = jax.lax.conv_general_dilated(
        x, w, window_strides=(2, 2), padding=((3, 3), (3, 3)),
        dimension_numbers=("NCHW", "OIHW", "NCHW"),
        precision=jax.lax.Precision.HIGHEST)
    bn = (conv - run_mean[None, :, None, None]) / jnp.sqrt(
        run_var[None, :, None, None] + eps)
    bn = bn * gamma[None, :, None, None] + beta[None, :, None, None]
    act = jnp.maximum(bn, 0.0)
    pooled = jax.lax.reduce_window(
        act, -jnp.inf, jax.lax.max,
        window_dimensions=(1, 1, 3, 3), window_strides=(1, 1, 2, 2),
        padding=((0, 0), (0, 0), (1, 1), (1, 1)))
    return pooled


if __name__ == "__main__":
    # Small shapes consistent with the module: batch=2, 3 input channels,
    # 16x16 spatial, num_init_features=64.
    N, Cin, H, W = 2, 3, 16, 16
    num_init_features = 64

    key = jax.random.PRNGKey(0)
    kx, kw, kg, kb, km, kv = jax.random.split(key, 6)

    x = jax.random.normal(kx, (N, Cin, H, W), dtype=jnp.float32)
    w = 0.05 * jax.random.normal(kw, (num_init_features, Cin, 7, 7),
                                 dtype=jnp.float32)
    gamma = 1.0 + 0.1 * jax.random.normal(kg, (num_init_features,), jnp.float32)
    beta = 0.1 * jax.random.normal(kb, (num_init_features,), jnp.float32)
    run_mean = 0.1 * jax.random.normal(km, (num_init_features,), jnp.float32)
    run_var = jax.random.uniform(kv, (num_init_features,), jnp.float32,
                                 minval=0.5, maxval=1.5)

    out = jax.block_until_ready(
        input_block_forward(x, w, gamma, beta, run_mean, run_var))
    ref = jax.block_until_ready(
        reference_forward(x, w, gamma, beta, run_mean, run_var))

    assert out.shape == (N, num_init_features, 4, 4), out.shape
    max_err = float(jnp.max(jnp.abs(out - ref)))
    assert jnp.allclose(out, ref, rtol=2e-2, atol=2e-2), max_err

    print("KERNEL_OK")
</pallas_src>

<mosaic_0001>
module attributes {stable_mosaic.version = 11 : i64} {
  func.func @conv_bn_relu_kernel(%arg0: i32, %arg1: i32, %arg2: memref<1x64x147xbf16, #tpu.memory_space<vmem>>, %arg3: memref<147x64xbf16, #tpu.memory_space<vmem>>, %arg4: memref<1x64xf32, #tpu.memory_space<vmem>>, %arg5: memref<1x64x64xf32, #tpu.memory_space<vmem>>) attributes {dimension_semantics = [#tpu.dimension_semantics<parallel>, #tpu.dimension_semantics<parallel>], iteration_bounds = array<i64: 2, 1>, scalar_prefetch = 0 : i64, scratch_operands = 0 : i64, tpu.core_type = #tpu.core_type<tc>, window_params = [{transform_indices = @transform_0, window_bounds = array<i64: 1, 64, 147>}, {pipeline_mode = #tpu.pipeline_mode<synchronous>, transform_indices = @transform_1, window_bounds = array<i64: 147, 64>}, {pipeline_mode = #tpu.pipeline_mode<synchronous>, transform_indices = @transform_2, window_bounds = array<i64: 1, 64>}, {transform_indices = @transform_3, window_bounds = array<i64: 1, 64, 64>}]} {
    %c0 = arith.constant 0 : index
    %c0_0 = arith.constant 0 : index
    %c0_1 = arith.constant 0 : index
    %0 = vector.load %arg2[%c0, %c0_0, %c0_1] : memref<1x64x147xbf16, #tpu.memory_space<vmem>>, vector<1x64x147xbf16>
    %1 = vector.shape_cast %0 : vector<1x64x147xbf16> to vector<64x147xbf16>
    %c0_2 = arith.constant 0 : index
    %c0_3 = arith.constant 0 : index
    %2 = vector.load %arg3[%c0_2, %c0_3] : memref<147x64xbf16, #tpu.memory_space<vmem>>, vector<147x64xbf16>
    %cst = arith.constant dense<0.000000e+00> : vector<64x64xf32>
    %3 = tpu.matmul %1, %2, %cst {dimension_numbers = #tpu.dot_dimension_numbers<[1], [0], [0], [1], [0, 0, 1, 1], [], []>} : vector<64x147xbf16>, vector<147x64xbf16>, vector<64x64xf32> -> vector<64x64xf32>
    %c0_4 = arith.constant 0 : index
    %c0_5 = arith.constant 0 : index
    %4 = vector.load %arg4[%c0_4, %c0_5] : memref<1x64xf32, #tpu.memory_space<vmem>>, vector<1x64xf32>
    %5 = vector.broadcast %4 : vector<1x64xf32> to vector<64x64xf32>
    %6 = arith.addf %3, %5 : vector<64x64xf32>
    %cst_6 = arith.constant 0.000000e+00 : f32
    %7 = vector.broadcast %cst_6 : f32 to vector<64x64xf32>
    %8 = arith.maximumf %6, %7 : vector<64x64xf32>
    %c0_7 = arith.constant 0 : index
    %c0_8 = arith.constant 0 : index
    %c0_9 = arith.constant 0 : index
    %9 = vector.load %arg5[%c0_7, %c0_8, %c0_9] : memref<1x64x64xf32, #tpu.memory_space<vmem>>, vector<1x64x64xf32>
    %10 = vector.shape_cast %9 : vector<1x64x64xf32> to vector<64x64xf32>
    %11 = vector.shape_cast %8 : vector<64x64xf32> to vector<1x64x64xf32>
    tpu.vector_store %arg5[%c0_7, %c0_8, %c0_9], %11 {strides = array<i32>} : memref<1x64x64xf32, #tpu.memory_space<vmem>>, vector<1x64x64xf32>,
    return
  }
  func.func @transform_0(%arg0: i32, %arg1: i32) -> (i32, i32, i32) {
    %c0_i32 = arith.constant 0 : i32
    %c0_i32_0 = arith.constant 0 : i32
    return %arg0, %arg1, %c0_i32 : i32, i32, i32
  }
  func.func @transform_1(%arg0: i32, %arg1: i32) -> (i32, i32) {
    %c0_i32 = arith.constant 0 : i32
    %c0_i32_0 = arith.constant 0 : i32
    %c0_i32_1 = arith.constant 0 : i32
    return %c0_i32, %c0_i32_0 : i32, i32
  }
  func.func @transform_2(%arg0: i32, %arg1: i32) -> (i32, i32) {
    %c0_i32 = arith.constant 0 : i32
    %c0_i32_0 = arith.constant 0 : i32
    %c0_i32_1 = arith.constant 0 : i32
    return %c0_i32, %c0_i32_0 : i32, i32
  }
  func.func @transform_3(%arg0: i32, %arg1: i32) -> (i32, i32, i32) {
    %c0_i32 = arith.constant 0 : i32
    %c0_i32_0 = arith.constant 0 : i32
    return %arg0, %arg1, %c0_i32 : i32, i32, i32
  }
}

</mosaic_0001>

<bundles_post_ra>
// kernel: tpu_custom_call.1
= control target key start
LH: loop header
LB: loop body
LE: loop exit
PB: predicated region body
PF: predicated region fallthrough
CT: control target
= control target key end

     0   :  { %8 = vsyncpa [#allocation3], 0  ;;  %s949_s0 = inlined_call_operand.vmem [shape: bf16[2,64,147], index: 0, kind: input, shape index: {}]   ;;  %s950_s1 = inlined_call_operand.vmem [shape: bf16[147,64], index: 1, kind: input, shape index: {}]   ;;  %s951_s2 = inlined_call_operand.vmem [shape: f32[1,64], index: 2, kind: input, shape index: {}]   ;;  %s952_s3 = inlined_call_operand.hbm [shape: f32[2,64,64], index: 3, kind: output, shape index: {}]  }
   0x1   :  { %10 = vsyncpa [#allocation3 + $0x1], 0  ;;  %s775_s12 = smov 0   ;;  %s777_s13 = smov 0  }
   0x2   :  { %s779_s14 = smov 0   ;;  %s781_s15 = smov 0  }
   0x3   :  { %s783_s16 = smov 0   ;;  %s785_s17 = smov 0  }
   0x4 LB: > { %s531_s18 = sadd.s32 4294967295, %s748_s17   ;;  %s532_s19 = sadd.s32 4294967294, %s748_s17   ;;  %s748_s17 = sphi %s785_s17, %s16_s17   ;;  %s744_s16 = sphi %s783_s16, %s959_s16   ;;  %s740_s15 = sphi %s781_s15, %s958_s15   ;;  %s736_s14 = sphi %s779_s14, %s957_s14   ;;  %s732_s13 = sphi %s777_s13, %s956_s13   ;;  %s728_s12 = sphi %s775_s12, %s955_s12  }
   0x5   : > { %s28_s20 = sadd.s32 1, %s744_s16  ;;  %s107_s21 = sadd.s32 1, %s736_s14 }
   0x6   : > { %p30_p0 = scmp.ge.s32.totalorder %s28_s20, 2  ;;  %p117_p1 = scmp.ne.s32.totalorder %s736_s14, %s732_s13 }
   0x7   : > { %p118_p2 = scmp.eq.s32.totalorder %s531_s18, 1  ;;  %p123_p3 = scmp.ne.s32.totalorder %s732_s13, %s728_s12 }
   0x8   : > { %s961_s20 = smov (%p30_p0, %s28_s20), 0  ;;  %p124_p5 = scmp.eq.s32.totalorder %s532_s19, 1 }
   0x9   : > { %p815_p4 = por %p118_p2, %p117_p1  ;;  %s102_s23 = ssub.s32 %s744_s16, %s961_s20 }
   0xa   : > { %p535_p6 = scmp.ge.s32.totalorder %s748_s17, 1  ;;  %p105_p7 = scmp.eq.s32.totalorder %s102_s23, 0 }
   0xb   : > { %p822_p8 = por %p124_p5, %p123_p3  ;;  %p162_p9 = scmp.lt.s32.totalorder %s748_s17, 3 }
   0xc   : > { %s828_s25 = scalar_select %p105_p7, %s736_s14, %s107_s21  }
   0xd   : > { %p163_p10 = pnand %p535_p6, %p162_p9 }
   0xe   : > { %v648_v0 = vld [vmem:[%s950_s1] sm:$0xff] (!%p163_p10)   ;;  %v750_v1 = vmov (!%p163_p10), 0   ;;  %v649_v2 = vld [vmem:[%s950_s1 + $0x8] sm:$0xff] (!%p163_p10)   ;;  %v650_v3 = vld [vmem:[%s950_s1 + $0x10] sm:$0xff] (!%p163_p10)   ;;  %p192_p11 = scmp.lt.s32.totalorder (!%p163_p10), %s740_s15, 1  ;;  %vm331_vm0 = vcmask (!%p163_p10), 154624  }
   0xf   : > { %166 = sbr.rel (%p163_p10) target bundleno = 296 (0x128), region = 32  ;;  %351 = vmatprep.subr.bf16.mxu0 (!%p163_p10), %v750_v1  ;;  %569 = vmatprep.subr.bf16.mxu1 (!%p163_p10), %v750_v1  ;;  %v651_v4 = vld [vmem:[%s950_s1 + $0x18] sm:$0xff] (!%p163_p10)   ;;  %v652_v6 = vld [vmem:[%s950_s1 + $0x20] sm:$0xff] (!%p163_p10)   ;;  %v653_v8 = vld [vmem:[%s950_s1 + $0x28] sm:$0xff] (!%p163_p10)   ;;  %vm344_vm1 = vcmask (!%p163_p10), 1040384   ;;  %vm345_vm2 = vcmask (!%p163_p10), 1041408  }
  0x10   : > { %352 = vmatpush1.bf16.msra.mxu0 (!%p163_p10), %v648_v0  ;;  %579 = vmatpush1.bf16.msra.mxu1 (!%p163_p10), %v648_v0  ;;  %v654_v9 = vld [vmem:[%s950_s1 + $0x30] sm:$0xff] (!%p163_p10)   ;;  %v655_v10 = vld [vmem:[%s950_s1 + $0x38] sm:$0xff] (!%p163_p10)   ;;  %v751_v11 = vmov (!%p163_p10), 65535   ;;  %v656_v13 = vld [vmem:[%s950_s1 + $0x40] sm:$0xff] (!%p163_p10)   ;;  %s188_s7 = sand.u32 (!%p163_p10), 1, %s732_s13   ;;  %vm424_vm3 = vcmask (!%p163_p10), 523264  }
  0x11   : > { %353 = vmatprep.subr.bf16.mxu0 (!%p163_p10), %v750_v1  ;;  %570 = vmatprep.subr.bf16.mxu1 (!%p163_p10), %v750_v1  ;;  %v346_v12 = vsel (!%p163_p10), %vm344_vm1, 4294967295, %v751_v11  ;;  %v657_v14 = vld [vmem:[%s950_s1 + $0x48] ss:$0 sps:$4 sm:$0x33] (!%p163_p10)   ;;  %v539_v23 = vld [vmem:[%s951_s2] ss:$0 sm:$0xff] (!%p163_p10) }
  0x12   : > { %v347_v15 = vsel (!%p163_p10), %vm345_vm2, %v346_v12, 0  ;;  %s536_s10 = sshll.u32 (!%p163_p10), %s188_s7, 6  ;;  %s568_s18 = sshll.u32 (!%p163_p10), %s740_s15, 10 }
  0x13   : > { %v349_v16 = vand.u32 (!%p163_p10), %v657_v14, %v347_v15  ;;  %s893_s26 = scalar_lea.hbm (!%p163_p10), %s952_s3, %s568_s18  ;;  %s752_s28 = smov (!%p163_p10), [#allocation2]  }
  0x14   : > { %354 = vmatpush1.bf16.msra.mxu0 (!%p163_p10), %v649_v2  ;;  %580 = vmatpush1.bf16.msra.mxu1 (!%p163_p10), %v649_v2  ;;  %s674_s29 = sshll.u32 (!%p163_p10), %s752_s28, 4  ;;  %s675_s29 = int_to_ptr.vmem [resolvable:$false] %s674_s29 }
  0x15   : > { %355 = vmatprep.subr.bf16.mxu0 (!%p163_p10), %v750_v1  ;;  %571 = vmatprep.subr.bf16.mxu1 (!%p163_p10), %v750_v1  ;;  %s676_s30 = scalar_lea.vmem (!%p163_p10), %s675_s29, 2048 }
  0x16   : > { %s193_s5 = scalar_select %p192_p11, %s740_s15, 1 }
  0x17   : > { %s903_s15 = scalar_lea.sflag [#allocation3], %s188_s7 }
  0x18   : > { %356 = vmatpush1.bf16.msra.mxu0 %v650_v3  ;;  %581 = vmatpush1.bf16.msra.mxu1 %v650_v3  ;;  %s567_s8 = sshll.u32 %s193_s5, 6 }
  0x19   : > { %357 = vmatprep.subr.bf16.mxu0 %v750_v1  ;;  %572 = vmatprep.subr.bf16.mxu1 %v750_v1  ;;  %s847_s11 = scalar_lea.vmem %s949_s0, %s567_s8 }
  0x1a   : > { %v660_v5 = vld [vmem:[%s847_s11 + $0x4] ss:$8 sps:$4 sm:$0xff]   ;;  %v658_v17 = vld [vmem:[%s847_s11] ss:$8 sps:$4 sm:$0xff]   ;;  %v664_v19 = vld [vmem:[%s847_s11 + $0x14] ss:$8 sps:$4 sm:$0xff]  }
  0x1b   : > { %v663_v7 = vld [vmem:[%s847_s11 + $0x24] ss:$8 sps:$4 sm:$0xff]   ;;  %558 = vmatprep.mubr.msk.bf16.mxu0 %vm331_vm0, %v660_v5  ;;  %v661_v18 = vld [vmem:[%s847_s11 + $0x20] ss:$8 sps:$4 sm:$0xff]   ;;  %v666_v20 = vld [vmem:[%s847_s11 + $0x34] ss:$8 sps:$4 sm:$0xff]  }
  0x1c   : > { %358 = vmatpush1.bf16.msra.mxu0 %v651_v4  ;;  %582 = vmatpush1.bf16.msra.mxu1 %v651_v4  ;;  %v668_v21 = vld [vmem:[%s847_s11 + $0x10] ss:$8 sps:$4 sm:$0xff]  }
  0x1d   : > { %359 = vmatprep.subr.bf16.mxu0 %v750_v1  ;;  %573 = vmatprep.subr.bf16.mxu1 %v750_v1  ;;  %v669_v22 = vld [vmem:[%s847_s11 + $0x30] ss:$8 sps:$4 sm:$0xff]   ;;  %s190_s11 = scalar_lea.vmem [#allocation2], %s536_s10 }
  0x1e   : > { %560 = vmatprep.mubr.msk.bf16.mxu1 %vm331_vm0, %v663_v7  ;;  %s449_s19 = sshll.u32 %s190_s11, 4  ;;  %s895_s19 = int_to_ptr.vmem [resolvable:$true] %s449_s19 }
  0x1f   : > { %s670_s27 = scalar_lea.vmem %s895_s19, 1024  ;;  %p677_p1 = scmp.lt.s32.totalorder %s895_s19, %s675_s29 }
  0x20   : > { %360 = vmatpush1.bf16.msra.mxu0 %v652_v6  ;;  %583 = vmatpush1.bf16.msra.mxu1 %v652_v6  ;;  %p671_p12 = scmp.ne.s32.totalorder %s895_s19, %s670_s27  ;;  %p678_p2 = scmp.lt.s32.totalorder %s676_s30, %s670_s27 }
  0x21   : > { %361 = vmatprep.subr.bf16.mxu0 %v750_v1  ;;  %574 = vmatprep.subr.bf16.mxu1 %v750_v1 }
  0x22   : > { %p672_p13 = pnand %p671_p12, %p815_p4  ;;  %p679_p3 = por %p678_p2, %p677_p1 }
  0x24   : > { %362 = vmatpush1.bf16.msra.mxu0 %v653_v8  ;;  %584 = vmatpush1.bf16.msra.mxu1 %v653_v8  ;;  %p673_p0 = pneg %p672_p13 }
  0x25   : > { %363 = vmatprep.subr.bf16.mxu0 %v750_v1  ;;  %575 = vmatprep.subr.bf16.mxu1 %v750_v1 }
  0x26   : > { %p680_p5 = pnand %p679_p3, %p673_p0 }
  0x28   : > { %364 = vmatpush1.bf16.msra.mxu0 %v654_v9  ;;  %585 = vmatpush1.bf16.msra.mxu1 %v654_v9 }
  0x29   : > { %365 = vmatprep.subr.bf16.mxu0 %v750_v1  ;;  %576 = vmatprep.subr.bf16.mxu1 %v750_v1 }
  0x2c   : > { %366 = vmatpush1.bf16.msra.mxu0 %v655_v10  ;;  %586 = vmatpush1.bf16.msra.mxu1 %v655_v10 }
  0x2d   : > { %367 = vmatprep.subr.bf16.mxu0 %v750_v1  ;;  %577 = vmatprep.subr.bf16.mxu1 %v750_v1 }
  0x30   : > { %368 = vmatpush1.bf16.msra.mxu0 %v656_v13  ;;  %587 = vmatpush1.bf16.msra.mxu1 %v656_v13 }
  0x31   : > { %369 = vmatprep.subr.bf16.mxu0 %v750_v1  ;;  %578 = vmatprep.subr.bf16.mxu1 %v750_v1 }
  0x34   : > { %370 = vmatpush1.bf16.msra.mxu0 %v349_v16  ;;  %588 = vmatpush1.bf16.msra.mxu1 %v349_v16 }
  0x37   : > { %384 = vmatmul.mubr.bf16.vlgmr.msra.gmra.mrb[0].mxu0 %v658_v17  ;;  %400 = vmatmul.mubr.bf16.vlgmr.msra.gmra.mrb[0].mxu1 %v661_v18 }
  0x38   : > { %559 = vmatprep.mubr.msk.bf16.mxu0 %vm331_vm0, %v664_v19  ;;  %561 = vmatprep.mubr.msk.bf16.mxu1 %vm331_vm0, %v666_v20 }
  0x3f   : > { %392 = vmatmul.mubr.bf16.gmra.mrb[4].mxu0 %v668_v21  ;;  %408 = vmatmul.mubr.bf16.gmra.mrb[4].mxu1 %v669_v22 }
 0x10a   : > { %v385_v24 = vpop.f32.mrb[0].mxu0  ;;  %v401_v25 = vpop.f32.mrb[0].mxu1 }
 0x10b   : > { %v386_v26 = vadd.f32 %v539_v23, %v385_v24  ;;  %v402_v27 = vadd.f32 %v539_v23, %v401_v25  ;;  %v387_v28 = vpop.f32.mrb[1].mxu0  ;;  %v403_v29 = vpop.f32.mrb[1].mxu1 }
 0x10c   : > { %v388_v30 = vpop.f32.mrb[2].mxu0  ;;  %v404_v31 = vpop.f32.mrb[2].mxu1 }
 0x10d   : > { %v416_v32 = vmax.f32 %v386_v26, 0.0  ;;  %v420_v33 = vmax.f32 %v402_v27, 0.0  ;;  %v389_v34 = vadd.f32 %v539_v23, %v388_v30  ;;  %v405_v35 = vadd.f32 %v539_v23, %v404_v31  ;;  %v390_v36 = vpop.f32.mrb[3].mxu0  ;;  %v406_v37 = vpop.f32.mrb[3].mxu1 }
 0x10f   : > { %425 = vst.msk [vmem:[%s190_s11] sm:$0xff] %vm424_vm3, %v416_v32  ;;  %429 = vst.msk [vmem:[%s190_s11 + $0x20] sm:$0xff] %vm424_vm3, %v420_v33  ;;  %v417_v38 = vmax.f32 %v389_v34, 0.0  ;;  %v421_v39 = vmax.f32 %v405_v35, 0.0 }
 0x111   : > { %426 = vst.msk [vmem:[%s190_s11 + $0x8] sm:$0xff] %vm424_vm3, %v417_v38  ;;  %430 = vst.msk [vmem:[%s190_s11 + $0x28] sm:$0xff] %vm424_vm3, %v421_v39 }
 0x112   : > { %v393_v40 = vpop.f32.mrb[4].mxu0  ;;  %v409_v41 = vpop.f32.mrb[4].mxu1 }
 0x113   : > { %v394_v42 = vadd.f32 %v539_v23, %v393_v40  ;;  %v410_v43 = vadd.f32 %v539_v23, %v409_v41  ;;  %v395_v44 = vpop.f32.mrb[5].mxu0  ;;  %v411_v45 = vpop.f32.mrb[5].mxu1 }
 0x114   : > { %v396_v46 = vpop.f32.mrb[6].mxu0  ;;  %v412_v47 = vpop.f32.mrb[6].mxu1 }
 0x115   : > { %v418_v48 = vmax.f32 %v394_v42, 0.0  ;;  %v422_v49 = vmax.f32 %v410_v43, 0.0  ;;  %v397_v50 = vadd.f32 %v539_v23, %v396_v46  ;;  %v413_v51 = vadd.f32 %v539_v23, %v412_v47  ;;  %v398_v52 = vpop.f32.mrb[7].mxu0  ;;  %v414_v53 = vpop.f32.mrb[7].mxu1 }
 0x117   : > { %427 = vst.msk [vmem:[%s190_s11 + $0x10] sm:$0xff] %vm424_vm3, %v418_v48  ;;  %431 = vst.msk [vmem:[%s190_s11 + $0x30] sm:$0xff] %vm424_vm3, %v422_v49  ;;  %v419_v54 = vmax.f32 %v397_v50, 0.0  ;;  %v423_v55 = vmax.f32 %v413_v51, 0.0 }
 0x119   : > { %428 = vst.msk [vmem:[%s190_s11 + $0x18] sm:$0xff] %vm424_vm3, %v419_v54  ;;  %432 = vst.msk [vmem:[%s190_s11 + $0x38] sm:$0xff] %vm424_vm3, %v423_v55 }
 0x11a   : > { %683 = shalt.err (!%p680_p5)
}
 0x11b   : > { %s684_s4 = scalar_lea.hbm %s893_s26, 1024  ;;  %s688_s7 = scalar_lea.hbm %s952_s3, 2048 }
 0x11c   : > { %p685_p6 = scmp.ne.s32.totalorder %s893_s26, %s684_s4  ;;  %p689_p10 = scmp.lt.u32.totalorder %s893_s26, %s952_s3 }
 0x11d   : > { %p690_p11 = scmp.lt.u32.totalorder %s688_s7, %s684_s4  ;;  %p692_p13 = scmp.lt.u32.totalorder %s684_s4, %s893_s26 }
 0x11e   : > { %p686_p7 = pnand %p685_p6, %p815_p4 }
 0x11f   : > { %p691_p12 = por %p690_p11, %p689_p10 }
 0x120   : > { %p687_p9 = pneg %p686_p7 }
 0x121   : > { %p693_p0 = por %p692_p13, %p691_p12 }
 0x123   : > { %p694_p1 = pnand %p693_p0, %p687_p9 }
 0x125   : > { %697 = shalt.err (!%p694_p1)
}
 0x126   : > { %s753_s10 = smov 128   ;;  %s754_s11 = smov 8  }
 0x127   : > { %589 = dma.vmem_to_hbm [thread:$0]  (%p815_p4), %s895_s19, 1024, %s893_s26, %s903_s15, %s753_s10, %s753_s10, %s754_s11  }
 0x128 PF: > { %p595_p2 = scmp.ge.s32.totalorder %s748_s17, 2  ;;  %s464_s18 = sand.u32 1, %s728_s12  }
 0x129   : > { %s465_s21 = scalar_lea.sflag [#allocation3], %s464_s18 }
 0x12a   : > { %p592_p3 = pnand %p595_p2, %p822_p8 }
 0x12c   : > { %723 = dma.done.wait (!%p592_p3), %s465_s21, 1024  }
 0x12d   : > { %725 = vsyncadd (!%p592_p3), %s465_s21, 4294966272  ;;  %s16_s17 = sadd.s32 1, %s748_s17   ;;  %s955_s12 = smov %s732_s13 }
 0x12e   : > { %p13_p5 = scmp.ge.s32.totalorder %s16_s17, 4   ;;  %s956_s13 = smov %s736_s14 }
 0x12f   : > { %s957_s14 = smov %s828_s25  ;;  %s958_s15 = smov %s744_s16 }
 0x130   : > { %s959_s16 = smov %s961_s20  ;;  %15 = sbr.rel (!%p13_p5) target bundleno = 4 (0x4), region = 67 }
 0x137   :  { %470 = vsyncpa [#allocation3], 1 }
 0x138   :  { %472 = vsyncpa [#allocation3 + $0x1], 1 }

</bundles_post_ra>
